<compile_context>
chip_gen: v6e
topology: v6e:2x2x1
jax: 0.10.0
libtpu: 0.0.40
codegen_flags: <defaults>
</compile_context>

<pallas_src>
import functools

import jax
import jax.numpy as jnp
from jax.experimental import pallas as pl
from jax.experimental.pallas import tpu as pltpu


def _rule_firing_kernel(deg_ref, mask_ref, out_ref):
    """One (rule-tile, batch-tile) block of the product t-norm, in log space.

    deg_ref  : (TB, K)  membership degrees (flattened inputs x terms), f32
    mask_ref : (K, TR)  binary premise mask for this rule tile, int8
    out_ref  : (TB, TR) rule firing strengths, f32
    """
    # EUP: log of the degrees.  Clamp so deg == 0 cannot produce (-inf) * 0 = NaN
    # inside the matmul; an exact 0 firing strength becomes ~1e-30 instead.
    logd = jnp.log(jnp.maximum(deg_ref[...].astype(jnp.float32), 1e-30))   # (TB, K)
    m = mask_ref[...].astype(jnp.float32)                                  # (K, TR)
    # Binary mask =>  prod_k (d*m + (1-m)) == exp( sum_k m * log d ):
    # the whole K reduction is a single MXU matmul (no (TB,K,TR) intermediate).
    log_fire = jnp.dot(logd, m, preferred_element_type=jnp.float32)        # MXU
    out_ref[...] = jnp.exp(log_fire).astype(out_ref.dtype)                 # EUP


def _round_up(x, m):
    return pl.cdiv(x, m) * m


def prepare_premise_mask(mask):
    """Static per-rule-base preprocessing, hoisted out of the per-call hot path.

    mask : (n_inputs, n_terms, n_rules) {0,1} combined premise mask
    returns (K, Rp) int8 mask with rules padded to a multiple of 128 lanes.
    Padded rule columns are all-zero -> firing 1.0, sliced off after the kernel.
    """
    V, T, R = mask.shape
    K = V * T
    Rp = _round_up(R, 128)
    m = jnp.asarray(mask).reshape(K, R).astype(jnp.int8)
    return jnp.pad(m, ((0, 0), (0, Rp - R)))


@functools.partial(jax.jit, static_argnames=("n_rules",))
def rulebase_forward(degrees, mask_kr, *, n_rules):
    """RuleBase.forward hot path.

    degrees : (B, n_inputs, n_terms) float — Membership.degrees
    mask_kr : (K, Rp) int8 — output of prepare_premise_mask (static per model)
    returns : (B, n_rules) rule firing strengths
    """
    B, V, T = degrees.shape
    K = V * T
    Km, Rp = mask_kr.shape
    assert Km == K, "mask must match membership (n_inputs * n_terms)"
    assert Rp % 128 == 0, "mask must be padded to a multiple of 128 rules"

    # Lane-dense rule tile: largest of {512, 256, 128} that divides Rp.
    tile_r = next(t for t in (512, 256, 128) if Rp % t == 0)
    # Sublane-aligned batch tile; don't pad tiny inference batches to 128 rows.
    tile_b = min(128, _round_up(B, 8))
    Bp = _round_up(B, tile_b)

    # Pad batch rows with 1.0 (log 1 = 0) so padded rows are inert; sliced below.
    deg_p = jnp.pad(degrees.reshape(B, K).astype(jnp.float32),
                    ((0, Bp - B), (0, 0)), constant_values=1.0)

    # Explicit VMEM budget: double-buffered degrees + mask + output tiles, with
    # margin.  Capped at 64 MiB so the plan also fits v7x's physical VMEM.
    vmem_need = 2 * (tile_b * K * 4 + K * tile_r * 1 + tile_b * tile_r * 4)
    vmem_limit = int(min(max(2 * vmem_need, 16 * 2**20), 64 * 2**20))

    out = pl.pallas_call(
        _rule_firing_kernel,
        out_shape=jax.ShapeDtypeStruct((Bp, Rp), jnp.float32),
        grid_spec=pltpu.PrefetchScalarGridSpec(
            num_scalar_prefetch=0,
            # Rules axis outer / batch axis inner: the (K, tile_r) mask block
            # index is constant across the inner loop, so the mask is DMA'd once
            # per rule tile instead of once per (batch, rule) block.
            grid=(Rp // tile_r, Bp // tile_b),
            in_specs=[
                pl.BlockSpec((tile_b, K), lambda j, i: (i, 0)),   # degrees tile
                pl.BlockSpec((K, tile_r), lambda j, i: (0, j)),   # mask tile
            ],
            out_specs=pl.BlockSpec((tile_b, tile_r), lambda j, i: (i, j)),
        ),
        compiler_params=pltpu.CompilerParams(
            dimension_semantics=("parallel", "parallel"),
            vmem_limit_bytes=vmem_limit,
        ),
    )(deg_p, mask_kr)

    return out[:B, :n_rules]


def _reference(degrees, mask):
    """Exact product t-norm reference (mirrors the PyTorch rule-base forward)."""
    B = degrees.shape[0]
    R = mask.shape[-1]
    d = degrees.reshape(B, -1)[:, :, None]            # (B, K, 1)
    m = mask.reshape(-1, R)[None, :, :]               # (1, K, R)
    return jnp.prod(d * m + (1.0 - m), axis=1)        # (B, R)


if __name__ == "__main__":
    key = jax.random.PRNGKey(0)

    # Small shapes implied by the module: a handful of rules over a few fuzzy
    # input variables, each with a few linguistic terms.
    batch, n_inputs, n_terms, n_rules = 2, 4, 4, 8

    # Membership degrees in [0, 1] — output of the fuzzification layer.
    degrees = jax.random.uniform(key, (batch, n_inputs, n_terms), dtype=jnp.float32)

    # Deterministic rule premises (what _combine_t_norms builds from rule.premise
    # indices): rule r uses term (r + v) % n_terms for every input variable v.
    v_idx = jnp.arange(n_inputs)[:, None, None]
    t_idx = jnp.arange(n_terms)[None, :, None]
    r_idx = jnp.arange(n_rules)[None, None, :]
    mask = (t_idx == (r_idx + v_idx) % n_terms).astype(jnp.float32)  # (V, T, R)

    # Static per-rule-base preprocessing: done once, outside the hot path.
    mask_kr = prepare_premise_mask(mask)

    out = rulebase_forward(degrees, mask_kr, n_rules=n_rules)
    jax.block_until_ready(out)

    ref = _reference(degrees, mask)
    assert out.shape == (batch, n_rules)
    # log/exp recast of the exact product: tolerance reflects f32 log/exp error.
    assert jnp.allclose(out, ref, atol=1e-5, rtol=1e-4), (out, ref)

    print("KERNEL_OK")
</pallas_src>

<mosaic_0001>
module attributes {stable_mosaic.version = 11 : i64} {
  func.func @_rule_firing_kernel(%arg0: i32, %arg1: i32, %arg2: memref<8x16xf32, #tpu.memory_space<vmem>>, %arg3: memref<16x128xi8, #tpu.memory_space<vmem>>, %arg4: memref<8x128xf32, #tpu.memory_space<vmem>>) attributes {dimension_semantics = [#tpu.dimension_semantics<parallel>, #tpu.dimension_semantics<parallel>], iteration_bounds = array<i64: 1, 1>, scalar_prefetch = 0 : i64, scratch_operands = 0 : i64, tpu.core_type = #tpu.core_type<tc>, window_params = [{transform_indices = @transform_0, window_bounds = array<i64: 8, 16>}, {transform_indices = @transform_1, window_bounds = array<i64: 16, 128>}, {transform_indices = @transform_2, window_bounds = array<i64: 8, 128>}]} {
    %c0 = arith.constant 0 : index
    %c0_0 = arith.constant 0 : index
    %0 = vector.load %arg2[%c0, %c0_0] : memref<8x16xf32, #tpu.memory_space<vmem>>, vector<8x16xf32>
    %cst = arith.constant 1.000000e-30 : f32
    %1 = vector.broadcast %cst : f32 to vector<8x16xf32>
    %2 = arith.maximumf %0, %1 : vector<8x16xf32>
    %3 = math.log %2 : vector<8x16xf32>
    %c0_1 = arith.constant 0 : index
    %c0_2 = arith.constant 0 : index
    %4 = vector.load %arg3[%c0_1, %c0_2] : memref<16x128xi8, #tpu.memory_space<vmem>>, vector<16x128xi8>
    %5 = arith.sitofp %4 : vector<16x128xi8> to vector<16x128xf32>
    %cst_3 = arith.constant dense<0.000000e+00> : vector<8x128xf32>
    %6 = tpu.matmul %3, %5, %cst_3 {dimension_numbers = #tpu.dot_dimension_numbers<[1], [0], [0], [1], [0, 0, 1, 1], [], []>} : vector<8x16xf32>, vector<16x128xf32>, vector<8x128xf32> -> vector<8x128xf32>
    %7 = math.exp %6 : vector<8x128xf32>
    %c0_4 = arith.constant 0 : index
    %c0_5 = arith.constant 0 : index
    %8 = vector.load %arg4[%c0_4, %c0_5] : memref<8x128xf32, #tpu.memory_space<vmem>>, vector<8x128xf32>
    tpu.vector_store %arg4[%c0_4, %c0_5], %7 {strides = array<i32>} : memref<8x128xf32, #tpu.memory_space<vmem>>, vector<8x128xf32>,
    return
  }
  func.func @transform_0(%arg0: i32, %arg1: i32) -> (i32, i32) {
    %c0_i32 = arith.constant 0 : i32
    %c0_i32_0 = arith.constant 0 : i32
    return %arg1, %c0_i32 : i32, i32
  }
  func.func @transform_1(%arg0: i32, %arg1: i32) -> (i32, i32) {
    %c0_i32 = arith.constant 0 : i32
    %c0_i32_0 = arith.constant 0 : i32
    return %c0_i32, %arg0 : i32, i32
  }
  func.func @transform_2(%arg0: i32, %arg1: i32) -> (i32, i32) {
    %c0_i32 = arith.constant 0 : i32
    return %arg1, %arg0 : i32, i32
  }
}

</mosaic_0001>

<bundles_post_ra>
// kernel: rulebase_forward.1
= control target key start
LH: loop header
LB: loop body
LE: loop exit
PB: predicated region body
PF: predicated region fallthrough
CT: control target
= control target key end

     0   :  { %v123_v0 = vmov 0.0   ;;  %vm124_vm0 = vmmov 0   ;;  %vm21_vm1 = vcmask 130048   ;;  %s149_s1 = inlined_call_operand.vmem [shape: s8[16,128], index: 1, kind: input, shape index: {}]   ;;  %s150_s0 = inlined_call_operand.vmem [shape: f32[8,16], index: 0, kind: input, shape index: {}]   ;;  %s151_s2 = inlined_call_operand.vmem [shape: f32[8,128], index: 2, kind: output, shape index: {}]  }
   0x1   :  { %110 = vmatprep.subr.mxu0 %v123_v0  ;;  %v104_v1 = vld [vmem:[%s149_s1] sm:$0xf]   ;;  %114 = vmatprep.mubr.msk.f32.mxu0 %vm124_vm0, %v123_v0 }
   0x2   :  { %v11_v2 = vld [vmem:[%s150_s0] sm:$0xff]  ;;  %v105_v3 = vunpack.c.0.s8 %v104_v1  ;;  %v106_v4 = vunpack.c.1.s8 %v104_v1 }
   0x3   :  { %v12_v5 = vmax.f32 %v11_v2, 1e-30 }
   0x4   :  { %v20_v6 = vcvt.s32.f32 %v106_v4  ;;  %v19_v7 = vcvt.s32.f32 %v105_v3 }
   0x5   :  { %119 = vlog2.f32 %v12_v5 }
   0x6   :  { %111 = vmatpush3.msra.mxu0 %v20_v6 }
   0x7   :  { %112 = vmatprep.subr.mxu0 %v123_v0 }
   0x8   :  { %113 = vmatpush3.msra.mxu0 %v19_v7 }
  0x12   :  { %v120_v8 = vpop.eup %119 }
  0x13   :  { %v14_v9 = vmul.f32 0.6931472, %v120_v8 }
  0x15   :  { %115 = vmatmul.mubr.msk.f32.vlgmr.msra.gmra.mxu0 %vm21_vm1, %v14_v9 }
  0xd5   :  { %v91_v10 = vpop.f32.mrf.mxu0 }
  0xd6   :  { %v95_v11 = vmul.f32 1.442695, %v91_v10 }
  0xd7   :  { %v116_v12 = vpop.f32.mrf.mxu0 }
  0xd8   :  { %121 = vpow2.f32 %v95_v11 }
  0xe5   :  { %v122_v13 = vpop.eup %121 }
  0xe6   :  { %97 = vst [vmem:[%s151_s2] sm:$0xff] %v122_v13 }

</bundles_post_ra>
